<compile_context>
chip_gen: v6e
topology: v6e:2x2x1
jax: 0.10.0
libtpu: 0.0.40
codegen_flags: <defaults>
</compile_context>

<pallas_src>
import math

import jax
import jax.numpy as jnp
from jax import lax
from jax.experimental import pallas as pl
from jax.experimental.pallas import tpu as pltpu

LANE = 128


def _round_up(x, m):
    return ((x + m - 1) // m) * m


def _pad_last(x, target):
    pad = target - x.shape[-1]
    if pad == 0:
        return x
    cfg = [(0, 0)] * (x.ndim - 1) + [(0, pad)]
    return jnp.pad(x, cfg)


# ----------------------------------------------------------------------------
# Fused Film kernel: one grid step = one module (Local / Global), ALL tasks.
#   idx_ref  : (1, T*node_num)  int32  concat(spt,qry) per task, lane-major
#   hout_ref : (N_graph, D1p)   f32    h_out of this module
#   w1_ref   : (node_num, D1p)
#   wfc_ref  : (D1p, D2p)              fc1 weight (transposed, zero-padded)
#   bfc_ref  : (1, D2p)
#   w2_ref   : (node_num, D2p)
# outputs:
#   tao1_ref : (T, d1, D1p)  = feats_t.T @ w1           (lane padding only)
#   tao2_ref : (T, d2, D2p)  = (feats_t @ wfc + bfc).T @ w2
# ----------------------------------------------------------------------------
def make_film_kernel(task_num, node_num, d1, d2):
    def kernel(idx_ref, hout_ref, w1_ref, wfc_ref, bfc_ref, w2_ref,
               tao1_ref, tao2_ref):
        hout = hout_ref[...]                                   # (N_graph, D1p)
        n_graph = hout.shape[0]
        total = task_num * node_num

        # One-hot row gather for ALL tasks in a single MXU matmul:
        #   onehot_T[j, t*node+i] = (j == idx[t, i])
        #   feats_all[t*node+i]   = h_out[idx[t, i]]
        row_ids = lax.broadcasted_iota(jnp.int32, (n_graph, total), 0)
        onehot_t = (row_ids == idx_ref[...]).astype(hout.dtype)
        cT = (((0,), (0,)), ((), ()))                  # contract axis 0 of both
        feats_all = lax.dot_general(onehot_t, hout, cT,
                                    preferred_element_type=jnp.float32)

        # h = fc1(feats) for all tasks at once (bias broadcast emitted once).
        h_all = jnp.dot(feats_all, wfc_ref[...],
                        preferred_element_type=jnp.float32) + bfc_ref[...]

        w1 = w1_ref[...]
        w2 = w2_ref[...]

        # Per-task tao_1 / tao_2 (task_num is tiny -> trace-time unrolled).
        for t in range(task_num):
            sl = slice(t * node_num, (t + 1) * node_num)
            tao1 = lax.dot_general(feats_all[sl], w1, cT,      # feats_t^T @ w1
                                   preferred_element_type=jnp.float32)
            tao2 = lax.dot_general(h_all[sl], w2, cT,          # h_t^T @ w2
                                   preferred_element_type=jnp.float32)
            tao1_ref[t] = tao1[:d1, :]
            tao2_ref[t] = tao2[:d2, :]

    return kernel


# ----------------------------------------------------------------------------
# Single pallas_call: grid=(2,) over the module axis, all tasks per step.
# ----------------------------------------------------------------------------
def fused_film_forward(idx, h_out, w1, wfc, bfc, w2, d1, d2):
    """idx: (T, node_num) int32; h_out: (2, N_graph, D1); w1: (2, node, D1);
    wfc: (2, D1, D2); bfc: (2, 1, D2); w2: (2, node, D2).
    Returns tao1 (2, T, D1, D1), tao2 (2, T, D2, D2) (module axis first)."""
    task_num, node_num = idx.shape
    n_graph = h_out.shape[1]
    d1p = _round_up(d1, LANE)
    d2p = _round_up(d2, LANE)
    total = task_num * node_num

    # Zero-pad lane dims to 128 once (padded lanes are exactly zero, so the
    # sliced-back tao1/tao2 are unaffected).
    hout_p = _pad_last(h_out, d1p)
    w1_p = _pad_last(w1, d1p)
    w2_p = _pad_last(w2, d2p)
    wfc_p = jnp.pad(wfc, ((0, 0), (0, d1p - d1), (0, d2p - d2)))
    bfc_p = _pad_last(bfc, d2p)
    idx_flat = idx.astype(jnp.int32).reshape(1, total)         # lane-major

    kernel = make_film_kernel(task_num, node_num, d1, d2)

    tao1_p, tao2_p = pl.pallas_call(
        kernel,
        grid=(2,),                        # module axis only; tasks batched inside
        in_specs=[
            pl.BlockSpec((1, total), lambda m: (0, 0)),               # idx (shared)
            pl.BlockSpec((None, n_graph, d1p), lambda m: (m, 0, 0)),  # h_out
            pl.BlockSpec((None, node_num, d1p), lambda m: (m, 0, 0)), # w1
            pl.BlockSpec((None, d1p, d2p), lambda m: (m, 0, 0)),      # wfc
            pl.BlockSpec((None, 1, d2p), lambda m: (m, 0, 0)),        # bfc
            pl.BlockSpec((None, node_num, d2p), lambda m: (m, 0, 0)), # w2
        ],
        out_specs=(
            pl.BlockSpec((None, task_num, d1, d1p), lambda m: (m, 0, 0, 0)),
            pl.BlockSpec((None, task_num, d2, d2p), lambda m: (m, 0, 0, 0)),
        ),
        out_shape=(
            jax.ShapeDtypeStruct((2, task_num, d1, d1p), jnp.float32),
            jax.ShapeDtypeStruct((2, task_num, d2, d2p), jnp.float32),
        ),
        compiler_params=pltpu.CompilerParams(
            dimension_semantics=("parallel",)),
    )(idx_flat, hout_p, w1_p, wfc_p, bfc_p, w2_p)

    # Strip lane padding only (sublane padding already removed in-kernel).
    return tao1_p[..., :d1], tao2_p[..., :d2]


# ----------------------------------------------------------------------------
# MetaGCN per-task Film stage for ALL tasks at once (gather happens in-kernel).
# ----------------------------------------------------------------------------
@jax.jit
def metagcn_film_stage(h_out_L, h_out_G, idx, local_params, global_params):
    d1 = h_out_L.shape[1]
    d2 = local_params["w2"].shape[1]
    h_out = jnp.stack((h_out_L, h_out_G))                          # (2, N, D1)
    w1 = jnp.stack((local_params["w1"], global_params["w1"]))      # (2, node, D1)
    wfc = jnp.stack((local_params["wfc"], global_params["wfc"]))   # (2, D1, D2)
    bfc = jnp.stack((local_params["bfc"], global_params["bfc"]))   # (2, 1, D2)
    w2 = jnp.stack((local_params["w2"], global_params["w2"]))      # (2, node, D2)
    tao1, tao2 = fused_film_forward(idx, h_out, w1, wfc, bfc, w2, d1, d2)
    # tao_1_L, tao_2_L, tao_1_G, tao_2_G  (each stacked over tasks)
    return tao1[0], tao2[0], tao1[1], tao2[1]


# ----------------------------------------------------------------------------
# Parameter construction (mirrors Film.__init__ / reset_parameters and the
# nn.Linear default init).
# ----------------------------------------------------------------------------
def init_film_params(key, node_num, d1, d2):
    k1, k2, k3, k4 = jax.random.split(key, 4)
    stdv1 = 1.0 / math.sqrt(d1)
    w1 = jax.random.uniform(k1, (node_num, d1), jnp.float32, -stdv1, stdv1)
    stdv2 = 1.0 / math.sqrt(d2)
    w2 = jax.random.uniform(k2, (node_num, d2), jnp.float32, -stdv2, stdv2)
    # nn.Linear(d1, d2): weight (d2, d1) U(-1/sqrt(d1), 1/sqrt(d1)); stored transposed.
    bound = 1.0 / math.sqrt(d1)
    wfc = jax.random.uniform(k3, (d1, d2), jnp.float32, -bound, bound)
    bfc = jax.random.uniform(k4, (1, d2), jnp.float32, -bound, bound)
    return {"w1": w1, "w2": w2, "wfc": wfc, "bfc": bfc}


def film_reference(feats, p):
    """Pure-JAX reference for correctness (torch semantics)."""
    tao1 = feats.T @ p["w1"]
    h = feats @ p["wfc"] + p["bfc"]
    tao2 = h.T @ p["w2"]
    return tao1, tao2


if __name__ == "__main__":
    # Module-consistent small config:
    #   n_way=2, k_spt=3, k_qry=5 -> node_num = (3+5)*2 = 16
    #   n_GCN = [32, 32, 16] -> D1 = 32, D2 = 16
    n_way, k_spt, k_qry = 2, 3, 5
    node_num = (k_spt + k_qry) * n_way          # 16 rows per task
    D1, D2 = 32, 16
    N_graph = 64                                 # total graph nodes
    task_num = 2

    root = jax.random.PRNGKey(0)
    k_hl, k_hg, k_idx, k_lp, k_gp = jax.random.split(root, 5)

    # Stand-ins for VGAE outputs h_out_L / h_out_G (VGAE itself not defined).
    h_out_L = jax.random.normal(k_hl, (N_graph, D1), jnp.float32)
    h_out_G = jax.random.normal(k_hg, (N_graph, D1), jnp.float32)

    # spt/qry indices for each task; kernel consumes concat(spt, qry) per task.
    perm = jax.random.permutation(k_idx, N_graph)
    spt_size = n_way * k_spt
    spt_idx = [perm[t * node_num: t * node_num + spt_size]
               for t in range(task_num)]
    qry_idx = [perm[t * node_num + spt_size: (t + 1) * node_num]
               for t in range(task_num)]
    idx = jnp.stack([jnp.concatenate((spt_idx[t], qry_idx[t]))
                     for t in range(task_num)]).astype(jnp.int32)   # (T, node_num)

    local_params = init_film_params(k_lp, node_num, D1, D2)
    global_params = init_film_params(k_gp, node_num, D1, D2)

    # Single fused kernel call for all tasks x {Local, Global}.
    t1L, t2L, t1G, t2G = metagcn_film_stage(h_out_L, h_out_G, idx,
                                            local_params, global_params)
    jax.block_until_ready((t1L, t2L, t1G, t2G))

    # Verify against the pure-JAX reference (torch semantics).
    ok = True
    for t in range(task_num):
        h_in_L = jnp.concatenate((h_out_L[spt_idx[t]], h_out_L[qry_idx[t]]), 0)
        h_in_G = jnp.concatenate((h_out_G[spt_idx[t]], h_out_G[qry_idx[t]]), 0)
        r1L, r2L = film_reference(h_in_L, local_params)
        r1G, r2G = film_reference(h_in_G, global_params)
        ok &= bool(jnp.allclose(t1L[t], r1L, atol=1e-4, rtol=1e-4))
        ok &= bool(jnp.allclose(t2L[t], r2L, atol=1e-4, rtol=1e-4))
        ok &= bool(jnp.allclose(t1G[t], r1G, atol=1e-4, rtol=1e-4))
        ok &= bool(jnp.allclose(t2G[t], r2G, atol=1e-4, rtol=1e-4))

    if ok:
        print("KERNEL_OK")
    else:
        print("KERNEL_MISMATCH")
</pallas_src>

<mosaic_0001>
module attributes {stable_mosaic.version = 11 : i64} {
  func.func @kernel(%arg0: i32, %arg1: memref<1x32xi32, #tpu.memory_space<vmem>>, %arg2: memref<1x64x128xf32, #tpu.memory_space<vmem>>, %arg3: memref<1x16x128xf32, #tpu.memory_space<vmem>>, %arg4: memref<1x128x128xf32, #tpu.memory_space<vmem>>, %arg5: memref<1x1x128xf32, #tpu.memory_space<vmem>>, %arg6: memref<1x16x128xf32, #tpu.memory_space<vmem>>, %arg7: memref<1x2x32x128xf32, #tpu.memory_space<vmem>>, %arg8: memref<1x2x16x128xf32, #tpu.memory_space<vmem>>) attributes {dimension_semantics = [#tpu.dimension_semantics<parallel>], iteration_bounds = array<i64: 2>, scalar_prefetch = 0 : i64, scratch_operands = 0 : i64, tpu.core_type = #tpu.core_type<tc>, window_params = [{pipeline_mode = #tpu.pipeline_mode<synchronous>, transform_indices = @transform_0, window_bounds = array<i64: 1, 32>}, {transform_indices = @transform_1, window_bounds = array<i64: 1, 64, 128>}, {transform_indices = @transform_2, window_bounds = array<i64: 1, 16, 128>}, {transform_indices = @transform_3, window_bounds = array<i64: 1, 128, 128>}, {transform_indices = @transform_4, window_bounds = array<i64: 1, 1, 128>}, {transform_indices = @transform_5, window_bounds = array<i64: 1, 16, 128>}, {transform_indices = @transform_6, window_bounds = array<i64: 1, 2, 32, 128>}, {transform_indices = @transform_7, window_bounds = array<i64: 1, 2, 16, 128>}]} {
    %c0 = arith.constant 0 : index
    %c0_0 = arith.constant 0 : index
    %c0_1 = arith.constant 0 : index
    %0 = vector.load %arg2[%c0, %c0_0, %c0_1] : memref<1x64x128xf32, #tpu.memory_space<vmem>>, vector<1x64x128xf32>
    %1 = vector.shape_cast %0 : vector<1x64x128xf32> to vector<64x128xf32>
    %2 = tpu.iota {dimensions = array<i32: 0>} : vector<64x32xi32>
    %c0_2 = arith.constant 0 : index
    %c0_3 = arith.constant 0 : index
    %3 = vector.load %arg1[%c0_2, %c0_3] : memref<1x32xi32, #tpu.memory_space<vmem>>, vector<1x32xi32>
    %4 = vector.broadcast %3 : vector<1x32xi32> to vector<64x32xi32>
    %5 = arith.cmpi eq, %2, %4 : vector<64x32xi32>
    %6 = arith.extui %5 : vector<64x32xi1> to vector<64x32xi32>
    %7 = arith.sitofp %6 : vector<64x32xi32> to vector<64x32xf32>
    %cst = arith.constant dense<0.000000e+00> : vector<32x128xf32>
    %8 = tpu.matmul %7, %1, %cst {dimension_numbers = #tpu.dot_dimension_numbers<[0], [0], [1], [1], [0, 1, 1, 1], [], []>} : vector<64x32xf32>, vector<64x128xf32>, vector<32x128xf32> -> vector<32x128xf32>
    %c0_4 = arith.constant 0 : index
    %c0_5 = arith.constant 0 : index
    %c0_6 = arith.constant 0 : index
    %9 = vector.load %arg4[%c0_4, %c0_5, %c0_6] : memref<1x128x128xf32, #tpu.memory_space<vmem>>, vector<1x128x128xf32>
    %10 = vector.shape_cast %9 : vector<1x128x128xf32> to vector<128x128xf32>
    %cst_7 = arith.constant dense<0.000000e+00> : vector<32x128xf32>
    %11 = tpu.matmul %8, %10, %cst_7 {dimension_numbers = #tpu.dot_dimension_numbers<[1], [0], [0], [1], [0, 0, 1, 1], [], []>} : vector<32x128xf32>, vector<128x128xf32>, vector<32x128xf32> -> vector<32x128xf32>
    %c0_8 = arith.constant 0 : index
    %c0_9 = arith.constant 0 : index
    %c0_10 = arith.constant 0 : index
    %12 = vector.load %arg5[%c0_8, %c0_9, %c0_10] : memref<1x1x128xf32, #tpu.memory_space<vmem>>, vector<1x1x128xf32>
    %13 = vector.shape_cast %12 : vector<1x1x128xf32> to vector<1x128xf32>
    %14 = vector.broadcast %13 : vector<1x128xf32> to vector<32x128xf32>
    %15 = arith.addf %11, %14 : vector<32x128xf32>
    %c0_11 = arith.constant 0 : index
    %c0_12 = arith.constant 0 : index
    %c0_13 = arith.constant 0 : index
    %16 = vector.load %arg3[%c0_11, %c0_12, %c0_13] : memref<1x16x128xf32, #tpu.memory_space<vmem>>, vector<1x16x128xf32>
    %17 = vector.shape_cast %16 : vector<1x16x128xf32> to vector<16x128xf32>
    %c0_14 = arith.constant 0 : index
    %c0_15 = arith.constant 0 : index
    %c0_16 = arith.constant 0 : index
    %18 = vector.load %arg6[%c0_14, %c0_15, %c0_16] : memref<1x16x128xf32, #tpu.memory_space<vmem>>, vector<1x16x128xf32>
    %19 = vector.shape_cast %18 : vector<1x16x128xf32> to vector<16x128xf32>
    %20 = vector.extract_strided_slice %8 {offsets = [0, 0], sizes = [16, 128], strides = [1, 1]} : vector<32x128xf32> to vector<16x128xf32>
    %cst_17 = arith.constant dense<0.000000e+00> : vector<128x128xf32>
    %21 = tpu.matmul %20, %17, %cst_17 {dimension_numbers = #tpu.dot_dimension_numbers<[0], [0], [1], [1], [0, 1, 1, 1], [], []>} : vector<16x128xf32>, vector<16x128xf32>, vector<128x128xf32> -> vector<128x128xf32>
    %22 = vector.extract_strided_slice %15 {offsets = [0, 0], sizes = [16, 128], strides = [1, 1]} : vector<32x128xf32> to vector<16x128xf32>
    %cst_18 = arith.constant dense<0.000000e+00> : vector<128x128xf32>
    %23 = tpu.matmul %22, %19, %cst_18 {dimension_numbers = #tpu.dot_dimension_numbers<[0], [0], [1], [1], [0, 1, 1, 1], [], []>} : vector<16x128xf32>, vector<16x128xf32>, vector<128x128xf32> -> vector<128x128xf32>
    %24 = vector.extract_strided_slice %21 {offsets = [0, 0], sizes = [32, 128], strides = [1, 1]} : vector<128x128xf32> to vector<32x128xf32>
    %c0_19 = arith.constant 0 : index
    %c0_20 = arith.constant 0 : index
    %c0_21 = arith.constant 0 : index
    %c0_22 = arith.constant 0 : index
    %25 = vector.load %arg7[%c0_19, %c0_20, %c0_21, %c0_22] : memref<1x2x32x128xf32, #tpu.memory_space<vmem>>, vector<1x1x32x128xf32>
    %26 = vector.shape_cast %25 : vector<1x1x32x128xf32> to vector<32x128xf32>
    %27 = vector.shape_cast %24 : vector<32x128xf32> to vector<1x1x32x128xf32>
    tpu.vector_store %arg7[%c0_19, %c0_20, %c0_21, %c0_22], %27 {strides = array<i32>} : memref<1x2x32x128xf32, #tpu.memory_space<vmem>>, vector<1x1x32x128xf32>,
    %28 = vector.extract_strided_slice %23 {offsets = [0, 0], sizes = [16, 128], strides = [1, 1]} : vector<128x128xf32> to vector<16x128xf32>
    %c0_23 = arith.constant 0 : index
    %c0_24 = arith.constant 0 : index
    %c0_25 = arith.constant 0 : index
    %c0_26 = arith.constant 0 : index
    %29 = vector.load %arg8[%c0_23, %c0_24, %c0_25, %c0_26] : memref<1x2x16x128xf32, #tpu.memory_space<vmem>>, vector<1x1x16x128xf32>
    %30 = vector.shape_cast %29 : vector<1x1x16x128xf32> to vector<16x128xf32>
    %31 = vector.shape_cast %28 : vector<16x128xf32> to vector<1x1x16x128xf32>
    tpu.vector_store %arg8[%c0_23, %c0_24, %c0_25, %c0_26], %31 {strides = array<i32>} : memref<1x2x16x128xf32, #tpu.memory_space<vmem>>, vector<1x1x16x128xf32>,
    %32 = vector.extract_strided_slice %8 {offsets = [16, 0], sizes = [16, 128], strides = [1, 1]} : vector<32x128xf32> to vector<16x128xf32>
    %cst_27 = arith.constant dense<0.000000e+00> : vector<128x128xf32>
    %33 = tpu.matmul %32, %17, %cst_27 {dimension_numbers = #tpu.dot_dimension_numbers<[0], [0], [1], [1], [0, 1, 1, 1], [], []>} : vector<16x128xf32>, vector<16x128xf32>, vector<128x128xf32> -> vector<128x128xf32>
    %34 = vector.extract_strided_slice %15 {offsets = [16, 0], sizes = [16, 128], strides = [1, 1]} : vector<32x128xf32> to vector<16x128xf32>
    %cst_28 = arith.constant dense<0.000000e+00> : vector<128x128xf32>
    %35 = tpu.matmul %34, %19, %cst_28 {dimension_numbers = #tpu.dot_dimension_numbers<[0], [0], [1], [1], [0, 1, 1, 1], [], []>} : vector<16x128xf32>, vector<16x128xf32>, vector<128x128xf32> -> vector<128x128xf32>
    %36 = vector.extract_strided_slice %33 {offsets = [0, 0], sizes = [32, 128], strides = [1, 1]} : vector<128x128xf32> to vector<32x128xf32>
    %c0_29 = arith.constant 0 : index
    %c1 = arith.constant 1 : index
    %c0_30 = arith.constant 0 : index
    %c0_31 = arith.constant 0 : index
    %37 = vector.load %arg7[%c0_29, %c1, %c0_30, %c0_31] : memref<1x2x32x128xf32, #tpu.memory_space<vmem>>, vector<1x1x32x128xf32>
    %38 = vector.shape_cast %37 : vector<1x1x32x128xf32> to vector<32x128xf32>
    %39 = vector.shape_cast %36 : vector<32x128xf32> to vector<1x1x32x128xf32>
    tpu.vector_store %arg7[%c0_29, %c1, %c0_30, %c0_31], %39 {strides = array<i32>} : memref<1x2x32x128xf32, #tpu.memory_space<vmem>>, vector<1x1x32x128xf32>,
    %40 = vector.extract_strided_slice %35 {offsets = [0, 0], sizes = [16, 128], strides = [1, 1]} : vector<128x128xf32> to vector<16x128xf32>
    %c0_32 = arith.constant 0 : index
    %c1_33 = arith.constant 1 : index
    %c0_34 = arith.constant 0 : index
    %c0_35 = arith.constant 0 : index
    %41 = vector.load %arg8[%c0_32, %c1_33, %c0_34, %c0_35] : memref<1x2x16x128xf32, #tpu.memory_space<vmem>>, vector<1x1x16x128xf32>
    %42 = vector.shape_cast %41 : vector<1x1x16x128xf32> to vector<16x128xf32>
    %43 = vector.shape_cast %40 : vector<16x128xf32> to vector<1x1x16x128xf32>
    tpu.vector_store %arg8[%c0_32, %c1_33, %c0_34, %c0_35], %43 {strides = array<i32>} : memref<1x2x16x128xf32, #tpu.memory_space<vmem>>, vector<1x1x16x128xf32>,
    return
  }
  func.func @transform_0(%arg0: i32) -> (i32, i32) {
    %c0_i32 = arith.constant 0 : i32
    %c0_i32_0 = arith.constant 0 : i32
    %c0_i32_1 = arith.constant 0 : i32
    return %c0_i32, %c0_i32_0 : i32, i32
  }
  func.func @transform_1(%arg0: i32) -> (i32, i32, i32) {
    %c0_i32 = arith.constant 0 : i32
    %c0_i32_0 = arith.constant 0 : i32
    %c0_i32_1 = arith.constant 0 : i32
    return %arg0, %c0_i32, %c0_i32_0 : i32, i32, i32
  }
  func.func @transform_2(%arg0: i32) -> (i32, i32, i32) {
    %c0_i32 = arith.constant 0 : i32
    %c0_i32_0 = arith.constant 0 : i32
    %c0_i32_1 = arith.constant 0 : i32
    return %arg0, %c0_i32, %c0_i32_0 : i32, i32, i32
  }
  func.func @transform_3(%arg0: i32) -> (i32, i32, i32) {
    %c0_i32 = arith.constant 0 : i32
    %c0_i32_0 = arith.constant 0 : i32
    %c0_i32_1 = arith.constant 0 : i32
    return %arg0, %c0_i32, %c0_i32_0 : i32, i32, i32
  }
  func.func @transform_4(%arg0: i32) -> (i32, i32, i32) {
    %c0_i32 = arith.constant 0 : i32
    %c0_i32_0 = arith.constant 0 : i32
    %c0_i32_1 = arith.constant 0 : i32
    return %arg0, %c0_i32, %c0_i32_0 : i32, i32, i32
  }
  func.func @transform_5(%arg0: i32) -> (i32, i32, i32) {
    %c0_i32 = arith.constant 0 : i32
    %c0_i32_0 = arith.constant 0 : i32
    %c0_i32_1 = arith.constant 0 : i32
    return %arg0, %c0_i32, %c0_i32_0 : i32, i32, i32
  }
  func.func @transform_6(%arg0: i32) -> (i32, i32, i32, i32) {
    %c0_i32 = arith.constant 0 : i32
    %c0_i32_0 = arith.constant 0 : i32
    %c0_i32_1 = arith.constant 0 : i32
    %c0_i32_2 = arith.constant 0 : i32
    return %arg0, %c0_i32, %c0_i32_0, %c0_i32_1 : i32, i32, i32, i32
  }
  func.func @transform_7(%arg0: i32) -> (i32, i32, i32, i32) {
    %c0_i32 = arith.constant 0 : i32
    %c0_i32_0 = arith.constant 0 : i32
    %c0_i32_1 = arith.constant 0 : i32
    %c0_i32_2 = arith.constant 0 : i32
    return %arg0, %c0_i32, %c0_i32_0, %c0_i32_1 : i32, i32, i32, i32
  }
}

</mosaic_0001>

<bundles_post_ra>
// kernel: metagcn_film_stage.1
= control target key start
LH: loop header
LB: loop body
LE: loop exit
PB: predicated region body
PF: predicated region fallthrough
CT: control target
= control target key end

     0   :  { %s2097_s24 = smov 0   ;;  %s2331_s0 = inlined_call_operand.vmem [shape: s32[1,32], index: 0, kind: input, shape index: {}]   ;;  %s2332_s1 = inlined_call_operand.vmem [shape: f32[2,64,128], index: 1, kind: input, shape index: {}]   ;;  %s2333_s2 = inlined_call_operand.vmem [shape: f32[2,16,128], index: 2, kind: input, shape index: {}]   ;;  %s2334_s3 = inlined_call_operand.vmem [shape: f32[2,128,128], index: 3, kind: input, shape index: {}]   ;;  %s2335_s4 = inlined_call_operand.vmem [shape: f32[2,1,128], index: 4, kind: input, shape index: {}]   ;;  %s2336_s5 = inlined_call_operand.vmem [shape: f32[2,16,128], index: 5, kind: input, shape index: {}]   ;;  %s2337_s6 = inlined_call_operand.vmem [shape: f32[2,2,32,128], index: 6, kind: output, shape index: {0}]   ;;  %s2338_s7 = inlined_call_operand.vmem [shape: f32[2,2,16,128], index: 7, kind: output, shape index: {1}]  }
   0x1 LB: > { %s1650_s25 = sadd.s32 4294967295, %s2054_s24   ;;  %p1654_p0 = scmp.ge.s32.totalorder %s2054_s24, 1  ;;  %s2054_s24 = sphi %s2097_s24, %s18_s24  }
   0x2   : > { %p278_p1 = scmp.lt.s32.totalorder %s2054_s24, 3 }
   0x4   : > { %p279_p2 = pnand %p1654_p0, %p278_p1 }
   0x5   : > { %p333_p3 = scmp.lt.s32.totalorder (!%p279_p2), %s1650_s25, 1 }
   0x6   : > { %282 = sbr.rel (%p279_p2) target bundleno = 951 (0x3b7), region = 44 }
   0xb   : > { %v374_v0 = vlaneseq  ;;  %v2108_v1 = vld [vmem:[%s2331_s0] ss:$0 sm:$0xff]  ;;  %s2340_s25 = smov (!%p333_p3, %s1650_s25), 1  ;;  %v2056_v5 = vmov 0.0   ;;  %vm444_vm8 = vcmask 523264   ;;  %vm686_vm9 = vcmask 130048  }
   0xc   : > { %s1753_s28 = sshll.u32 %s2340_s25, 6  ;;  %s1755_s9 = sshll.u32 %s2340_s25, 7 }
   0xd   : > { %v2110_v2 = vshrl.u32 %v374_v0, 7  ;;  %s2125_s8 = scalar_lea.vmem %s2332_s1, %s1753_s28  ;;  %s2142_s12 = scalar_lea.vmem %s2334_s3, %s1755_s9 }
   0xe   : > { %v373_v7 = vld [vmem:[%s2125_s8 + $0x38] sm:$0xff]  ;;  %v372_v8 = vld [vmem:[%s2125_s8 + $0x30] sm:$0xff]  ;;  %v371_v11 = vld [vmem:[%s2125_s8 + $0x28] sm:$0xff]  ;;  %s1754_s13 = sshll.u32 %s2340_s25, 4  ;;  %s350_s22 = scalar_lea.vmem %s2335_s4, %s2340_s25 }
   0xf   : > { %vm388_vm0 = vcmp.eq.s32.totalorder %v2110_v2, %v2108_v1  ;;  %v376_v3 = vadd.s32 8, %v2110_v2  ;;  %v377_v4 = vadd.s32 16, %v2110_v2  ;;  %1863 = vmatprep.subr.mxu0 %v373_v7  ;;  %v378_v10 = vadd.s32 24, %v2110_v2  ;;  %v370_v12 = vld [vmem:[%s2125_s8 + $0x20] sm:$0xff]  ;;  %v369_v15 = vld [vmem:[%s2125_s8 + $0x18] sm:$0xff]  ;;  %v368_v16 = vld [vmem:[%s2125_s8 + $0x10] sm:$0xff]  ;;  %s342_s16 = scalar_lea.vmem %s2333_s2, %s1754_s13  ;;  %s355_s19 = scalar_lea.vmem %s2336_s5, %s1754_s13 }
  0x10   : > { %v1668_v6 = vsel %vm388_vm0, 1.0, %v2056_v5  ;;  %1864 = vmatpush3.msra.mxu0 %v373_v7  ;;  %v379_v14 = vadd.s32 32, %v2110_v2  ;;  %v557_v18 = vld [vmem:[%s2142_s12 + $0x78] sm:$0xff]  ;;  %v380_v19 = vadd.s32 40, %v2110_v2  ;;  %v367_v20 = vld [vmem:[%s2125_s8 + $0x8] sm:$0xff]  ;;  %v556_v21 = vld [vmem:[%s2142_s12 + $0x70] sm:$0xff]  ;;  %s2238_s27 = scalar_lea.vmem %s2337_s6, %s1753_s28 }
  0x11   : > { %412 = vxpose.xlu0.b32.start [1/8] (short) (narrow) %v1668_v6, 32  ;;  %vm389_vm1 = vcmp.eq.s32.totalorder %v376_v3, %v2108_v1  ;;  %vm390_vm2 = vcmp.eq.s32.totalorder %v377_v4, %v2108_v1  ;;  %1865 = vmatprep.subr.mxu0 %v372_v8  ;;  %vm391_vm3 = vcmp.eq.s32.totalorder %v378_v10, %v2108_v1  ;;  %v366_v22 = vld [vmem:[%s2125_s8] sm:$0xff]  ;;  %v555_v23 = vld [vmem:[%s2142_s12 + $0x68] sm:$0xff]  ;;  %v381_v25 = vadd.s32 48, %v2110_v2  ;;  %v553_v28 = vld [vmem:[%s2142_s12 + $0x58] sm:$0xff]  ;;  %s1758_s28 = sshll.u32 %s2340_s25, 5 }
  0x12   : > { %v1669_v9 = vsel %vm389_vm1, 1.0, %v2056_v5  ;;  %1866 = vmatpush3.msra.mxu0 %v372_v8  ;;  %v1670_v13 = vsel %vm390_vm2, 1.0, %v2056_v5  ;;  %v1671_v17 = vsel %vm391_vm3, 1.0, %v2056_v5  ;;  %vm392_vm4 = vcmp.eq.s32.totalorder %v379_v14, %v2108_v1  ;;  %1885 = vmatprep.subr.mxu1 %v557_v18  ;;  %v554_v26 = vld [vmem:[%s2142_s12 + $0x60] sm:$0xff]  ;;  %v552_v30 = vld [vmem:[%s2142_s12 + $0x50] sm:$0xff]  ;;  %v551_v32 = vld [vmem:[%s2142_s12 + $0x48] sm:$0xff]  ;;  %s2318_s8 = scalar_lea.vmem %s2338_s7, %s1758_s28 }
  0x13   : > { %1867 = vmatprep.subr.mxu0 %v371_v11  ;;  %1886 = vmatpush3.msra.mxu1 %v557_v18  ;;  %v1672_v24 = vsel %vm392_vm4, 1.0, %v2056_v5  ;;  %vm393_vm5 = vcmp.eq.s32.totalorder %v380_v19, %v2108_v1  ;;  %vm394_vm6 = vcmp.eq.s32.totalorder %v381_v25, %v2108_v1  ;;  %v382_v29 = vadd.s32 56, %v2110_v2  ;;  %v550_v33 = vld [vmem:[%s2142_s12 + $0x40] sm:$0xff]  ;;  %v549_v35 = vld [vmem:[%s2142_s12 + $0x38] sm:$0xff]  ;;  %v548_v36 = vld [vmem:[%s2142_s12 + $0x30] sm:$0xff] }
  0x14   : > { %1868 = vmatpush3.msra.mxu0 %v371_v11  ;;  %1887 = vmatprep.subr.mxu1 %v556_v21  ;;  %v1673_v27 = vsel %vm393_vm5, 1.0, %v2056_v5  ;;  %v1674_v31 = vsel %vm394_vm6, 1.0, %v2056_v5  ;;  %v547_v37 = vld [vmem:[%s2142_s12 + $0x28] sm:$0xff]  ;;  %v546_v38 = vld [vmem:[%s2142_s12 + $0x20] sm:$0xff]  ;;  %v545_v39 = vld [vmem:[%s2142_s12 + $0x18] sm:$0xff] }
  0x15   : > { %413 = vxpose.xlu0.b32.cont [2/8] (short) (narrow) %v1669_v9, 32  ;;  %1869 = vmatprep.subr.mxu0 %v370_v12  ;;  %vm395_vm7 = vcmp.eq.s32.totalorder %v382_v29, %v2108_v1  ;;  %v544_v40 = vld [vmem:[%s2142_s12 + $0x10] sm:$0xff]  ;;  %v543_v45 = vld [vmem:[%s2142_s12 + $0x8] sm:$0xff]  ;;  %v542_v46 = vld [vmem:[%s2142_s12] sm:$0xff] }
  0x16   : > { %1870 = vmatpush3.msra.mxu0 %v370_v12  ;;  %1888 = vmatpush3.msra.mxu1 %v556_v21  ;;  %v1675_v34 = vsel %vm395_vm7, 1.0, %v2056_v5  ;;  %v2183_v51 = vld [vmem:[%s342_s16 + $0x8] sm:$0xff]  ;;  %v2188_v53 = vld [vmem:[%s342_s16] sm:$0xff] }
  0x17   : > { %1871 = vmatprep.subr.mxu0 %v369_v15  ;;  %1889 = vmatprep.subr.mxu1 %v555_v23  ;;  %v2185_v52 = vld [vmem:[%s355_s19 + $0x8] sm:$0xff]  ;;  %v2191_v54 = vld [vmem:[%s355_s19] sm:$0xff] }
  0x18   : > { %1872 = vmatpush3.msra.mxu0 %v369_v15  ;;  %1890 = vmatpush3.msra.mxu1 %v555_v23  ;;  %v1680_v8 = vld [vmem:[%s350_s22] ss:$0 sm:$0xff] }
  0x19   : > { %414 = vxpose.xlu0.b32.cont [3/8] (short) (narrow) %v1670_v13, 32  ;;  %1873 = vmatprep.subr.mxu0 %v368_v16 }
  0x1a   : > { %1874 = vmatpush3.msra.mxu0 %v368_v16  ;;  %1891 = vmatprep.subr.mxu1 %v554_v26 }
  0x1b   : > { %1875 = vmatprep.subr.mxu0 %v367_v20  ;;  %1892 = vmatpush3.msra.mxu1 %v554_v26 }
  0x1c   : > { %1876 = vmatpush3.msra.mxu0 %v367_v20  ;;  %1893 = vmatprep.subr.mxu1 %v553_v28 }
  0x1d   : > { %415 = vxpose.xlu0.b32.cont [4/8] (short) (narrow) %v1671_v17, 32  ;;  %1877 = vmatprep.subr.mxu0 %v366_v22 }
  0x1e   : > { %1878 = vmatpush3.msra.mxu0 %v366_v22  ;;  %1894 = vmatpush3.msra.mxu1 %v553_v28 }
  0x1f   : > { %1895 = vmatprep.subr.mxu1 %v552_v30  ;;  %1923 = vmatprep.subr.mxu0 %v2183_v51 }
  0x20   : > { %1896 = vmatpush3.msra.mxu1 %v552_v30 }
  0x21   : > { %416 = vxpose.xlu0.b32.cont [5/8] (short) (narrow) %v1672_v24, 32  ;;  %1897 = vmatprep.subr.mxu1 %v551_v32 }
  0x22   : > { %1898 = vmatpush3.msra.mxu1 %v551_v32 }
  0x23   : > { %1899 = vmatprep.subr.mxu1 %v550_v33 }
  0x24   : > { %1900 = vmatpush3.msra.mxu1 %v550_v33 }
  0x25   : > { %417 = vxpose.xlu0.b32.cont [6/8] (short) (narrow) %v1673_v27, 32  ;;  %1901 = vmatprep.subr.mxu1 %v549_v35 }
  0x26   : > { %1902 = vmatpush3.msra.mxu1 %v549_v35 }
  0x27   : > { %1903 = vmatprep.subr.mxu1 %v548_v36 }
  0x28   : > { %1904 = vmatpush3.msra.mxu1 %v548_v36 }
  0x29   : > { %418 = vxpose.xlu0.b32.cont [7/8] (short) (narrow) %v1674_v31, 32  ;;  %1905 = vmatprep.subr.mxu1 %v547_v37 }
  0x2a   : > { %1906 = vmatpush3.msra.mxu1 %v547_v37 }
  0x2b   : > { %1907 = vmatprep.subr.mxu1 %v546_v38 }
  0x2c   : > { %1908 = vmatpush3.msra.mxu1 %v546_v38 }
  0x2d   : > { %419 = vxpose.xlu0.b32.end [8/8] (short) (narrow) %v1675_v34, 32  ;;  %1909 = vmatprep.subr.mxu1 %v545_v39 }
  0x2e   : > { %1910 = vmatpush3.msra.mxu1 %v545_v39 }
  0x2f   : > { %1911 = vmatprep.subr.mxu1 %v544_v40 }
  0x30   : > { %1912 = vmatpush3.msra.mxu1 %v544_v40 }
  0x31   : > { %1913 = vmatprep.subr.mxu1 %v543_v45 }
  0x32   : > { %1914 = vmatpush3.msra.mxu1 %v543_v45 }
  0x33   : > { %1915 = vmatprep.subr.mxu1 %v542_v46 }
  0x34   : > { %1916 = vmatpush3.msra.mxu1 %v542_v46 }
  0x35   : > { %2035 = vmatprep.subr.mxu1 %v2185_v52 }
  0x8d   : > { %v428_v41 = vpop.trf.xlu0 }
  0x8e   : > { %1879 = vmatprep.mubr.msk.f32.mxu0 %vm444_vm8, %v428_v41 }
  0x91   : > { %v429_v42 = vpop.trf.xlu0 }
  0x92   : > { %1880 = vmatmul.mubr.msk.f32.vlgmr.msra.gmra.mxu0 %vm444_vm8, %v429_v42 }
  0x93   : > { %1924 = vmatpush3.msra.mxu0 %v2183_v51 }
  0x94   : > { %1925 = vmatprep.subr.mxu0 %v2188_v53 }
  0x95   : > { %v430_v43 = vpop.trf.xlu0  ;;  %1926 = vmatpush3.msra.mxu0 %v2188_v53 }
  0x96   : > { %1882 = vmatprep.mubr.msk.f32.mxu0 %vm444_vm8, %v430_v43  ;;  %1951 = vmatprep.subr.mxu0 %v2185_v52 }
  0x99   : > { %v431_v44 = vpop.trf.xlu0 }
  0x9a   : > { %1883 = vmatmul.mubr.msk.f32.gmra.mxu0 %vm444_vm8, %v431_v44 }
 0x152   : > { %v1881_v47 = vpop.f32.mrf.mxu0 }
 0x154   : > { %v523_v48 = vpop.f32.mrf.mxu0 }
 0x155   : > { %654 = vxpose.xlu1.b32.start [1/2] (short) %v523_v48, 128  ;;  %1917 = vmatprep.mubr.f32.mxu1 %v523_v48 }
 0x156   : > { %1918 = vmatmul.mubr.f32.vlgmr.msra.gmra.mxu1 %v1881_v47 }
 0x157   : > { %2037 = vmatpush3.msra.mxu1 %v2185_v52 }
 0x158   : > { %2036 = vmatprep.subr.mxu1 %v2191_v54 }
 0x159   : > { %655 = vxpose.xlu1.b32.end [2/2] (short) %v1881_v47, 128  ;;  %2038 = vmatpush3.msra.mxu1 %v2191_v54 }
 0x15a   : > { %v1884_v49 = vpop.f32.mrf.mxu0  ;;  %2007 = vmatprep.subr.mxu1 %v2185_v52 }
 0x15c   : > { %v533_v50 = vpop.f32.mrf.mxu0 }
 0x15d   : > { %1920 = vmatprep.mubr.f32.mxu1 %v533_v50  ;;  %1085 = vxpose.xlu0.b32.start [1/2] (short) %v533_v50, 128 }
 0x15e   : > { %1921 = vmatmul.mubr.f32.gmra.mxu1 %v1884_v49 }
 0x161   : > { %1086 = vxpose.xlu0.b32.end [2/2] (short) %v1884_v49, 128 }
 0x1d1   : > { %v670_v55 = vpop.trf.xlu1 }
 0x1d2   : > { %1927 = vmatprep.mubr.msk.f32.mxu0 %vm686_vm9, %v670_v55 }
 0x1d5   : > { %v671_v56 = vpop.trf.xlu1 }
 0x1d6   : > { %1928 = vmatmul.mubr.msk.f32.vlgmr.msra.gmra.mxu0 %vm686_vm9, %v671_v56 }
 0x1d7   : > { %1952 = vmatpush3.msra.mxu0 %v2185_v52 }
 0x1d8   : > { %1953 = vmatprep.subr.mxu0 %v2191_v54 }
 0x1d9   : > { %v672_v57 = vpop.trf.xlu1  ;;  %1954 = vmatpush3.msra.mxu0 %v2191_v54  ;;  %v1101_v16 = vpop.trf.xlu0 }
 0x1da   : > { %1930 = vmatprep.mubr.msk.f32.mxu0 %vm686_vm9, %v672_v57  ;;  %1979 = vmatprep.subr.mxu0 %v2183_v51 }
 0x1dd   : > { %v673_v58 = vpop.trf.xlu1  ;;  %v1102_v17 = vpop.trf.xlu0 }
 0x1de   : > { %1931 = vmatmul.mubr.msk.f32.gmra.mxu0 %vm686_vm9, %v673_v58 }
 0x1e1   : > { %v674_v59 = vpop.trf.xlu1  ;;  %v1103_v18 = vpop.trf.xlu0 }
 0x1e2   : > { %1933 = vmatprep.mubr.msk.f32.mxu0 %vm686_vm9, %v674_v59 }
 0x1e5   : > { %v675_v60 = vpop.trf.xlu1  ;;  %v1104_v19 = vpop.trf.xlu0 }
 0x1e6   : > { %1934 = vmatmul.mubr.msk.f32.gmra.mxu0 %vm686_vm9, %v675_v60 }
 0x1e9   : > { %v676_v61 = vpop.trf.xlu1  ;;  %v1105_v20 = vpop.trf.xlu0 }
 0x1ea   : > { %1936 = vmatprep.mubr.msk.f32.mxu0 %vm686_vm9, %v676_v61 }
 0x1ed   : > { %v677_v62 = vpop.trf.xlu1  ;;  %v1106_v21 = vpop.trf.xlu0 }
 0x1ee   : > { %1937 = vmatmul.mubr.msk.f32.gmra.mxu0 %vm686_vm9, %v677_v62 }
 0x1f1   : > { %v678_v63 = vpop.trf.xlu1  ;;  %v1107_v22 = vpop.trf.xlu0 }
 0x1f2   : > { %1939 = vmatprep.mubr.msk.f32.mxu0 %vm686_vm9, %v678_v63 }
 0x1f5   : > { %v679_v0 = vpop.trf.xlu1  ;;  %v1108_v23 = vpop.trf.xlu0 }
 0x1f6   : > { %1940 = vmatmul.mubr.msk.f32.gmra.mxu0 %vm686_vm9, %v679_v0 }
 0x1f9   : > { %v680_v1 = vpop.trf.xlu1  ;;  %v1109_v24 = vpop.trf.xlu0 }
 0x1fa   : > { %1942 = vmatprep.mubr.msk.f32.mxu0 %vm686_vm9, %v680_v1 }
 0x1fd   : > { %v681_v2 = vpop.trf.xlu1  ;;  %v1110_v25 = vpop.trf.xlu0 }
 0x1fe   : > { %1943 = vmatmul.mubr.msk.f32.gmra.mxu0 %vm686_vm9, %v681_v2 }
 0x201   : > { %v682_v3 = vpop.trf.xlu1  ;;  %v1111_v26 = vpop.trf.xlu0 }
 0x202   : > { %1945 = vmatprep.mubr.msk.f32.mxu0 %vm686_vm9, %v682_v3 }
 0x205   : > { %v683_v4 = vpop.trf.xlu1  ;;  %v2225_v27 = vpop.trf.xlu0 }
 0x206   : > { %1946 = vmatmul.mubr.msk.f32.gmra.mxu0 %vm686_vm9, %v683_v4 }
 0x209   : > { %v684_v5 = vpop.trf.xlu1  ;;  %v2227_v28 = vpop.trf.xlu0 }
 0x20a   : > { %1948 = vmatprep.mubr.msk.f32.mxu0 %vm686_vm9, %v684_v5 }
 0x20d   : > { %v685_v6 = vpop.trf.xlu1  ;;  %v2229_v29 = vpop.trf.xlu0 }
 0x20e   : > { %1949 = vmatmul.mubr.msk.f32.gmra.mxu0 %vm686_vm9, %v685_v6 }
 0x211   : > { %v2231_v30 = vpop.trf.xlu0 }
 0x215   : > { %v2242_v34 = vpop.trf.xlu0 }
 0x216   : > { %v1919_v7 = vpop.f32.mrf.mxu1 }
 0x217   : > { %v637_v11 = vadd.f32 %v1919_v7, %v1680_v8 }
 0x218   : > { %v631_v9 = vpop.f32.mrf.mxu1 }
 0x219   : > { %v632_v10 = vadd.f32 %v1680_v8, %v631_v9 }
 0x21b   : > { %868 = vxpose.xlu1.b32.start [1/2] (short) %v632_v10, 128 }
 0x21e   : > { %v1922_v12 = vpop.f32.mrf.mxu1 }
 0x21f   : > { %869 = vxpose.xlu1.b32.end [2/2] (short) %v637_v11, 128  ;;  %v647_v15 = vadd.f32 %v1922_v12, %v1680_v8 }
 0x220   : > { %v641_v13 = vpop.f32.mrf.mxu1 }
 0x221   : > { %v642_v14 = vadd.f32 %v1680_v8, %v641_v13 }
 0x223   : > { %1298 = vxpose.xlu0.b32.start [1/2] (short) %v642_v14, 128 }
 0x227   : > { %1299 = vxpose.xlu0.b32.end [2/2] (short) %v647_v15, 128 }
 0x296   : > { %v1929_v31 = vpop.f32.mrf.mxu0 }
 0x297   : > { %v884_v32 = vpop.trf.xlu1  ;;  %1080 = vst [vmem:[%s2238_s27 + $0x8] sm:$0xff] %v1929_v31 }
 0x298   : > { %1955 = vmatprep.mubr.msk.f32.mxu0 %vm686_vm9, %v884_v32  ;;  %v801_v33 = vpop.f32.mrf.mxu0 }
 0x299   : > { %1079 = vst [vmem:[%s2238_s27] sm:$0xff] %v801_v33 }
 0x29b   : > { %v885_v35 = vpop.trf.xlu1 }
 0x29c   : > { %1956 = vmatmul.mubr.msk.f32.vlgmr.msra.gmra.mxu0 %vm686_vm9, %v885_v35 }
 0x29d   : > { %1980 = vmatpush3.msra.mxu0 %v2183_v51 }
 0x29e   : > { %1981 = vmatprep.subr.mxu0 %v2188_v53  ;;  %v1932_v36 = vpop.f32.mrf.mxu0 }
 0x29f   : > { %v886_v37 = vpop.trf.xlu1  ;;  %1982 = vmatpush3.msra.mxu0 %v2188_v53  ;;  %v2249_v38 = vpop.trf.xlu0  ;;  %1082 = vst [vmem:[%s2238_s27 + $0x18] sm:$0xff] %v1932_v36 }
 0x2a0   : > { %1958 = vmatprep.mubr.msk.f32.mxu0 %vm686_vm9, %v886_v37  ;;  %v811_v39 = vpop.f32.mrf.mxu0 }
 0x2a1   : > { %1081 = vst [vmem:[%s2238_s27 + $0x10] sm:$0xff] %v811_v39 }
 0x2a3   : > { %v887_v40 = vpop.trf.xlu1  ;;  %v2254_v41 = vpop.trf.xlu0 }
 0x2a4   : > { %1959 = vmatmul.mubr.msk.f32.gmra.mxu0 %vm686_vm9, %v887_v40 }
 0x2a5   : > { %1983 = vmatprep.mubr.msk.f32.mxu0 %vm686_vm9, %v1101_v16 }
 0x2a6   : > { %v1935_v42 = vpop.f32.mrf.mxu0 }
 0x2a7   : > { %v888_v43 = vpop.trf.xlu1  ;;  %v2258_v44 = vpop.trf.xlu0 }
 0x2a8   : > { %1961 = vmatprep.mubr.msk.f32.mxu1 %vm686_vm9, %v888_v43  ;;  %1984 = vmatmul.mubr.msk.f32.vlgmr.msra.gmra.mxu0 %vm686_vm9, %v1102_v17  ;;  %v821_v45 = vpop.f32.mrf.mxu0 }
 0x2a9   : > { %1986 = vmatprep.mubr.msk.f32.mxu0 %vm686_vm9, %v1103_v18 }
 0x2ab   : > { %v889_v46 = vpop.trf.xlu1  ;;  %v1317_v47 = vpop.trf.xlu0 }
 0x2ac   : > { %1962 = vmatmul.mubr.msk.f32.vlgmr.msra.gmra.mxu1 %vm686_vm9, %v889_v46  ;;  %1987 = vmatmul.mubr.msk.f32.gmra.mxu0 %vm686_vm9, %v1104_v19 }
 0x2ad   : > { %1989 = vmatprep.mubr.msk.f32.mxu0 %vm686_vm9, %v1105_v20  ;;  %2008 = vmatpush3.msra.mxu1 %v2185_v52 }
 0x2ae   : > { %2009 = vmatprep.subr.mxu1 %v2191_v54  ;;  %v1938_v48 = vpop.f32.mrf.mxu0 }
 0x2af   : > { %v890_v49 = vpop.trf.xlu1  ;;  %v1318_v50 = vpop.trf.xlu0  ;;  %2010 = vmatpush3.msra.mxu1 %v2191_v54 }
 0x2b0   : > { %1964 = vmatprep.mubr.msk.f32.mxu1 %vm686_vm9, %v890_v49  ;;  %1990 = vmatmul.mubr.msk.f32.gmra.mxu0 %vm686_vm9, %v1106_v21  ;;  %v829_v51 = vpop.f32.mrf.mxu0 }
 0x2b1   : > { %1992 = vmatprep.mubr.msk.f32.mxu0 %vm686_vm9, %v1107_v22 }
 0x2b3   : > { %v891_v53 = vpop.trf.xlu1  ;;  %v1319_v52 = vpop.trf.xlu0 }
 0x2b4   : > { %1965 = vmatmul.mubr.msk.f32.gmra.mxu1 %vm686_vm9, %v891_v53  ;;  %1993 = vmatmul.mubr.msk.f32.gmra.mxu0 %vm686_vm9, %v1108_v23 }
 0x2b5   : > { %1995 = vmatprep.mubr.msk.f32.mxu0 %vm686_vm9, %v1109_v24 }
 0x2b6   : > { %v1941_v55 = vpop.f32.mrf.mxu0 }
 0x2b7   : > { %v892_v56 = vpop.trf.xlu1  ;;  %v1320_v58 = vpop.trf.xlu0 }
 0x2b8   : > { %1967 = vmatprep.mubr.msk.f32.mxu1 %vm686_vm9, %v892_v56  ;;  %1996 = vmatmul.mubr.msk.f32.gmra.mxu0 %vm686_vm9, %v1110_v25  ;;  %v837_v54 = vpop.f32.mrf.mxu0 }
 0x2b9   : > { %1998 = vmatprep.mubr.msk.f32.mxu0 %vm686_vm9, %v1111_v26 }
 0x2bb   : > { %v893_v57 = vpop.trf.xlu1  ;;  %v1321_v62 = vpop.trf.xlu0 }
 0x2bc   : > { %1968 = vmatmul.mubr.msk.f32.gmra.mxu1 %vm686_vm9, %v893_v57  ;;  %1999 = vmatmul.mubr.msk.f32.gmra.mxu0 %vm686_vm9, %v2225_v27 }
 0x2bd   : > { %2001 = vmatprep.mubr.msk.f32.mxu0 %vm686_vm9, %v2227_v28 }
 0x2be   : > { %v1944_v59 = vpop.f32.mrf.mxu0 }
 0x2bf   : > { %v894_v60 = vpop.trf.xlu1  ;;  %v1322_v2 = vpop.trf.xlu0 }
 0x2c0   : > { %1970 = vmatprep.mubr.msk.f32.mxu1 %vm686_vm9, %v894_v60  ;;  %2002 = vmatmul.mubr.msk.f32.gmra.mxu0 %vm686_vm9, %v2229_v29  ;;  %v845_v61 = vpop.f32.mrf.mxu0 }
 0x2c1   : > { %2004 = vmatprep.mubr.msk.f32.mxu0 %vm686_vm9, %v2231_v30 }
 0x2c3   : > { %v895_v63 = vpop.trf.xlu1  ;;  %v1323_v5 = vpop.trf.xlu0 }
 0x2c4   : > { %1971 = vmatmul.mubr.msk.f32.gmra.mxu1 %vm686_vm9, %v895_v63  ;;  %2005 = vmatmul.mubr.msk.f32.gmra.mxu0 %vm686_vm9, %v2242_v34 }
 0x2c6   : > { %v1947_v0 = vpop.f32.mrf.mxu0 }
 0x2c7   : > { %v896_v1 = vpop.trf.xlu1  ;;  %v1324_v10 = vpop.trf.xlu0 }
 0x2c8   : > { %1973 = vmatprep.mubr.msk.f32.mxu1 %vm686_vm9, %v896_v1  ;;  %v853_v3 = vpop.f32.mrf.mxu0 }
 0x2cb   : > { %v897_v4 = vpop.trf.xlu1  ;;  %v1325_v11 = vpop.trf.xlu0 }
 0x2cc   : > { %1974 = vmatmul.mubr.msk.f32.gmra.mxu1 %vm686_vm9, %v897_v4 }
 0x2ce   : > { %v1950_v6 = vpop.f32.mrf.mxu0 }
 0x2cf   : > { %v898_v7 = vpop.trf.xlu1  ;;  %v1326_v12 = vpop.trf.xlu0 }
 0x2d0   : > { %1976 = vmatprep.mubr.msk.f32.mxu1 %vm686_vm9, %v898_v7  ;;  %v861_v8 = vpop.f32.mrf.mxu0 }
 0x2d3   : > { %v899_v9 = vpop.trf.xlu1  ;;  %v1327_v13 = vpop.trf.xlu0 }
 0x2d4   : > { %1977 = vmatmul.mubr.msk.f32.gmra.mxu1 %vm686_vm9, %v899_v9 }
 0x2d5   : > { %2011 = vmatprep.mubr.msk.f32.mxu1 %vm686_vm9, %v2249_v38 }
 0x2d7   : > { %v1328_v14 = vpop.trf.xlu0 }
 0x2d8   : > { %2012 = vmatmul.mubr.msk.f32.vlgmr.msra.gmra.mxu1 %vm686_vm9, %v2254_v41 }
 0x2d9   : > { %2014 = vmatprep.mubr.msk.f32.mxu1 %vm686_vm9, %v2258_v44 }
 0x2db   : > { %v1329_v15 = vpop.trf.xlu0 }
 0x2dc   : > { %2015 = vmatmul.mubr.msk.f32.gmra.mxu1 %vm686_vm9, %v1317_v47 }
 0x2dd   : > { %2017 = vmatprep.mubr.msk.f32.mxu1 %vm686_vm9, %v1318_v50 }
 0x2e0   : > { %2018 = vmatmul.mubr.msk.f32.gmra.mxu1 %vm686_vm9, %v1319_v52 }
 0x2e1   : > { %2020 = vmatprep.mubr.msk.f32.mxu1 %vm686_vm9, %v1320_v58 }
 0x2e4   : > { %2021 = vmatmul.mubr.msk.f32.gmra.mxu1 %vm686_vm9, %v1321_v62 }
 0x2e5   : > { %2023 = vmatprep.mubr.msk.f32.mxu1 %vm686_vm9, %v1322_v2 }
 0x2e8   : > { %2024 = vmatmul.mubr.msk.f32.gmra.mxu1 %vm686_vm9, %v1323_v5 }
 0x2e9   : > { %2026 = vmatprep.mubr.msk.f32.mxu1 %vm686_vm9, %v1324_v10 }
 0x2ec   : > { %2027 = vmatmul.mubr.msk.f32.gmra.mxu1 %vm686_vm9, %v1325_v11 }
 0x2ed   : > { %2029 = vmatprep.mubr.msk.f32.mxu1 %vm686_vm9, %v1326_v12 }
 0x2f0   : > { %2030 = vmatmul.mubr.msk.f32.gmra.mxu1 %vm686_vm9, %v1327_v13 }
 0x2f1   : > { %2032 = vmatprep.mubr.msk.f32.mxu1 %vm686_vm9, %v1328_v14 }
 0x2f4   : > { %2033 = vmatmul.mubr.msk.f32.gmra.mxu1 %vm686_vm9, %v1329_v15 }
 0x35c   : > { %v1957_v16 = vpop.f32.mrf.mxu0 }
 0x35d   : > { %1084 = vst [vmem:[%s2318_s8 + $0x8] sm:$0xff] %v1957_v16 }
 0x35e   : > { %v1014_v17 = vpop.f32.mrf.mxu0 }
 0x35f   : > { %1083 = vst [vmem:[%s2318_s8] sm:$0xff] %v1014_v17 }
 0x364   : > { %v1960_v18 = vpop.f32.mrf.mxu0 }
 0x366   : > { %v1024_v19 = vpop.f32.mrf.mxu0 }
 0x368   : > { %v1985_v20 = vpop.f32.mrf.mxu0 }
 0x369   : > { %1746 = vst [vmem:[%s2238_s27 + $0x28] sm:$0xff] %v1985_v20 }
 0x36a   : > { %v1231_v21 = vpop.f32.mrf.mxu0 }
 0x36b   : > { %1745 = vst [vmem:[%s2238_s27 + $0x20] sm:$0xff] %v1231_v21 }
 0x36c   : > { %v1963_v22 = vpop.f32.mrf.mxu1  ;;  %v1988_v23 = vpop.f32.mrf.mxu0 }
 0x36d   : > { %1748 = vst [vmem:[%s2238_s27 + $0x38] sm:$0xff] %v1988_v23 }
 0x36e   : > { %v1032_v24 = vpop.f32.mrf.mxu1  ;;  %v1241_v25 = vpop.f32.mrf.mxu0 }
 0x36f   : > { %1747 = vst [vmem:[%s2238_s27 + $0x30] sm:$0xff] %v1241_v25 }
 0x370   : > { %v1991_v26 = vpop.f32.mrf.mxu0 }
 0x372   : > { %v1251_v27 = vpop.f32.mrf.mxu0 }
 0x374   : > { %v1966_v28 = vpop.f32.mrf.mxu1  ;;  %v1994_v29 = vpop.f32.mrf.mxu0 }
 0x376   : > { %v1040_v30 = vpop.f32.mrf.mxu1  ;;  %v1259_v31 = vpop.f32.mrf.mxu0 }
 0x378   : > { %v1997_v32 = vpop.f32.mrf.mxu0 }
 0x37a   : > { %v1267_v33 = vpop.f32.mrf.mxu0 }
 0x37c   : > { %v1969_v34 = vpop.f32.mrf.mxu1  ;;  %v2000_v35 = vpop.f32.mrf.mxu0 }
 0x37e   : > { %v1048_v36 = vpop.f32.mrf.mxu1  ;;  %v1275_v37 = vpop.f32.mrf.mxu0 }
 0x380   : > { %v2003_v38 = vpop.f32.mrf.mxu0 }
 0x382   : > { %v1283_v39 = vpop.f32.mrf.mxu0 }
 0x384   : > { %v1972_v40 = vpop.f32.mrf.mxu1  ;;  %v2006_v41 = vpop.f32.mrf.mxu0 }
 0x386   : > { %v1056_v42 = vpop.f32.mrf.mxu1  ;;  %v1291_v43 = vpop.f32.mrf.mxu0 }
 0x38c   : > { %v1975_v44 = vpop.f32.mrf.mxu1 }
 0x38e   : > { %v1064_v45 = vpop.f32.mrf.mxu1 }
 0x394   : > { %v1978_v46 = vpop.f32.mrf.mxu1 }
 0x396   : > { %v1072_v47 = vpop.f32.mrf.mxu1 }
 0x398   : > { %v2013_v48 = vpop.f32.mrf.mxu1 }
 0x399   : > { %1750 = vst [vmem:[%s2318_s8 + $0x18] sm:$0xff] %v2013_v48 }
 0x39a   : > { %v1444_v49 = vpop.f32.mrf.mxu1 }
 0x39b   : > { %1749 = vst [vmem:[%s2318_s8 + $0x10] sm:$0xff] %v1444_v49 }
 0x39c   : > { %v2016_v50 = vpop.f32.mrf.mxu1 }
 0x39e   : > { %v1454_v51 = vpop.f32.mrf.mxu1 }
 0x3a0   : > { %v2019_v53 = vpop.f32.mrf.mxu1 }
 0x3a2   : > { %v1462_v52 = vpop.f32.mrf.mxu1 }
 0x3a4   : > { %v2022_v55 = vpop.f32.mrf.mxu1 }
 0x3a6   : > { %v1470_v56 = vpop.f32.mrf.mxu1 }
 0x3a8   : > { %v2025_v54 = vpop.f32.mrf.mxu1 }
 0x3aa   : > { %v1478_v57 = vpop.f32.mrf.mxu1 }
 0x3ac   : > { %v2028_v58 = vpop.f32.mrf.mxu1 }
 0x3ae   : > { %v1486_v59 = vpop.f32.mrf.mxu1 }
 0x3b0   : > { %v2031_v60 = vpop.f32.mrf.mxu1 }
 0x3b2   : > { %v1494_v61 = vpop.f32.mrf.mxu1 }
 0x3b4   : > { %v2034_v62 = vpop.f32.mrf.mxu1 }
 0x3b6   : > { %v1502_v63 = vpop.f32.mrf.mxu1 }
 0x3b7 PF: > { %s18_s24 = sadd.s32 1, %s2054_s24  }
 0x3b8   : > { %p15_p4 = scmp.ge.s32.totalorder %s18_s24, 4  }
 0x3ba   :  { %17 = sbr.rel (!%p15_p4) target bundleno = 1 (0x1), region = 100 }

</bundles_post_ra>
